<compile_context>
chip_gen: v6e
topology: v6e:2x2x1
jax: 0.10.0
libtpu: 0.0.40
codegen_flags: <defaults>
</compile_context>

<pallas_src>
import functools

import jax
import jax.numpy as jnp
from jax.experimental import pallas as pl
from jax.experimental.pallas import tpu as pltpu


_NEG_BIG = -1e30  # bias for padded vocab columns: exp() underflows to exactly 0


def _round_up(n: int, m: int) -> int:
    return ((n + m - 1) // m) * m


def _generator_kernel(x_ref, w_ref, b_ref, o_ref, *, softmax: bool, matmul_dtype):
    # x_ref: (tm, D)  row tile of activations (input dtype)
    # w_ref: (D, Vp)  projection weight, already in matmul_dtype, VMEM-resident
    # b_ref: (1, Vp)  bias (f32); padded columns hold -1e30
    # o_ref: (tm, Vp) output tile (lane-dense: Vp is a multiple of 128)
    x = x_ref[...].astype(matmul_dtype)   # cheap VPU cast; MXU runs native bf16
    w = w_ref[...]

    # Linear layer: MXU matmul with f32 accumulation, bias add on the VPU.
    logits = jnp.dot(x, w, preferred_element_type=jnp.float32) + b_ref[...]

    if softmax:
        # Numerically stable log-softmax over the (padded) vocab axis.
        # Padded columns carry a -1e30 bias -> exp() == 0, so they never
        # perturb the normalizer.  exp/log -> EUP slot, max/sum -> XLU slot.
        m = jnp.max(logits, axis=-1, keepdims=True)
        z = logits - m
        lse = jnp.log(jnp.sum(jnp.exp(z), axis=-1, keepdims=True))
        out = z - lse
    else:
        out = logits

    o_ref[...] = out.astype(o_ref.dtype)


def generator_forward(x, weight, bias, softmax=True, *, tm=512,
                      matmul_dtype=jnp.bfloat16, out_dtype=jnp.float32):
    """Pallas equivalent of Generator.forward.

    x:      (..., d_model)
    weight: (d_model, vocab)   (transposed nn.Linear weight)
    bias:   (vocab,)
    returns (..., vocab) log-probabilities (or raw logits if softmax=False)

    tm:           row tile (multiple of 128 recommended; default 512)
    matmul_dtype: MXU input dtype (bf16 default: native MXU passes, less HBM)
    out_dtype:    output dtype (f32 default; bf16 halves output store bytes)
    """
    orig_shape = x.shape
    d_model = orig_shape[-1]
    vocab = weight.shape[1]

    x2d = x.reshape(-1, d_model)
    m_rows = x2d.shape[0]

    # ---- vocab padding to a multiple of 128: lane-dense output stores + full
    #      MXU N-dimension.  Zero weight columns keep the matmul exact; the
    #      -1e30 bias keeps log-softmax exact over the real vocab.
    v_pad = _round_up(vocab, 128)
    w_p = weight.astype(matmul_dtype)
    b_p = bias.astype(jnp.float32).reshape(1, vocab)
    if v_pad != vocab:
        w_p = jnp.pad(w_p, ((0, 0), (0, v_pad - vocab)))
        b_p = jnp.pad(b_p, ((0, 0), (0, v_pad - vocab)), constant_values=_NEG_BIG)

    # ---- row tile selection.  No wrapper-side row padding (that would be an
    #      extra HBM read+write of the activation slab): the grid uses cdiv
    #      and Pallas masks the edge tile's out-of-range rows on store.
    if m_rows >= tm:
        tm_eff = tm
        # keep >= 2 grid steps when possible so both v7x TensorCores get work
        if pl.cdiv(m_rows, tm_eff) < 2 and m_rows >= 256:
            tm_eff = max(128, _round_up(pl.cdiv(m_rows, 2), 128))
    elif m_rows >= 256:
        # two 128-aligned tiles (megacore-friendly) for medium row counts
        tm_eff = _round_up(pl.cdiv(m_rows, 2), 128)
    else:
        # tiny inputs: a single sublane-aligned tile
        tm_eff = max(8, _round_up(m_rows, 8))
    grid_m = pl.cdiv(m_rows, tm_eff)

    # ---- VMEM budget: resident W + bias + double-buffered x/out tiles.
    #      Only raise the scoped limit when the default would be tight; stay
    #      comfortably under v7x's 64 MiB physical VMEM.
    x_bytes = jnp.dtype(x.dtype).itemsize
    o_bytes = jnp.dtype(out_dtype).itemsize
    w_bytes = jnp.dtype(matmul_dtype).itemsize
    vmem_needed = (2 * tm_eff * d_model * x_bytes          # x tile, double-buffered
                   + 2 * tm_eff * v_pad * o_bytes          # out tile, double-buffered
                   + 2 * d_model * v_pad * w_bytes         # resident W (worst-case 2 bufs)
                   + 2 * v_pad * 4)                        # resident bias
    cp_kwargs = dict(dimension_semantics=("parallel",))
    if vmem_needed > 24 * 1024 * 1024:
        cp_kwargs["vmem_limit_bytes"] = min(int(1.5 * vmem_needed), 60 * 1024 * 1024)

    # Advisory cost hint so XLA schedules neighbours sensibly around the call.
    flops = 2 * m_rows * d_model * v_pad + 2 * m_rows * v_pad
    transcendentals = (m_rows * v_pad + m_rows) if softmax else 0
    bytes_accessed = (m_rows * d_model * x_bytes
                      + d_model * v_pad * w_bytes
                      + v_pad * 4
                      + m_rows * v_pad * o_bytes)
    cost = pl.CostEstimate(flops=flops, transcendentals=transcendentals,
                           bytes_accessed=bytes_accessed)

    kernel = functools.partial(_generator_kernel, softmax=softmax,
                               matmul_dtype=matmul_dtype)

    out = pl.pallas_call(
        kernel,
        out_shape=jax.ShapeDtypeStruct((m_rows, v_pad), out_dtype),
        grid_spec=pltpu.PrefetchScalarGridSpec(
            num_scalar_prefetch=0,
            grid=(grid_m,),
            in_specs=[
                pl.BlockSpec((tm_eff, d_model), lambda i: (i, 0)),  # x row tile
                pl.BlockSpec((d_model, v_pad), lambda i: (0, 0)),   # full W (resident)
                pl.BlockSpec((1, v_pad), lambda i: (0, 0)),         # full bias
            ],
            out_specs=pl.BlockSpec((tm_eff, v_pad), lambda i: (i, 0)),
        ),
        compiler_params=pltpu.CompilerParams(**cp_kwargs),
        cost_estimate=cost,
    )(x2d, w_p, b_p)

    out = out[:, :vocab]                      # drop padded vocab columns
    return out.reshape(*orig_shape[:-1], vocab)


def reference_forward(x, weight, bias, softmax=True, matmul_dtype=jnp.float32):
    """Pure-JAX reference (f32 math; inputs optionally rounded to matmul_dtype)."""
    xr = x.astype(matmul_dtype).astype(jnp.float32)
    wr = weight.astype(matmul_dtype).astype(jnp.float32)
    linear = jnp.einsum("...d,dv->...v", xr, wr,
                        precision=jax.lax.Precision.HIGHEST) + bias.astype(jnp.float32)
    if softmax:
        return jax.nn.log_softmax(linear, axis=-1)
    return linear


if __name__ == "__main__":
    # Small shapes consistent with the module's forward.
    batch, seq, d_model, vocab = 2, 8, 32, 28   # vocab deliberately not 128-aligned

    key = jax.random.PRNGKey(0)
    kx, kw, kb = jax.random.split(key, 3)

    x = jax.random.normal(kx, (batch, seq, d_model), dtype=jnp.float32)
    # Deterministic synthetic parameters (not a checkpoint load).
    weight = (jax.random.normal(kw, (d_model, vocab), dtype=jnp.float32)
              * (1.0 / jnp.sqrt(d_model)))
    bias = jax.random.normal(kb, (vocab,), dtype=jnp.float32) * 0.01

    # 1) default path: bf16 MXU matmul + log-softmax, f32 output
    out = jax.block_until_ready(generator_forward(x, weight, bias, softmax=True))
    ref = reference_forward(x, weight, bias, softmax=True, matmul_dtype=jnp.bfloat16)
    assert out.shape == (batch, seq, vocab)
    assert jnp.allclose(out, ref, atol=2e-3, rtol=2e-3), "log_softmax mismatch (bf16 path)"
    # log-probs over the *real* vocab must exponentiate-sum to 1 (pad cols excluded)
    assert jnp.allclose(jnp.sum(jnp.exp(out), axis=-1), 1.0, atol=1e-3), "not normalized"

    # 2) raw-logits path (softmax=False)
    logits = jax.block_until_ready(generator_forward(x, weight, bias, softmax=False))
    ref_logits = reference_forward(x, weight, bias, softmax=False,
                                   matmul_dtype=jnp.bfloat16)
    assert jnp.allclose(logits, ref_logits, atol=2e-3, rtol=2e-3), "logits mismatch"

    # 3) full-f32 matmul path (looser tolerance: MXU f32 uses multi-pass emulation)
    out32 = jax.block_until_ready(
        generator_forward(x, weight, bias, softmax=True, matmul_dtype=jnp.float32))
    ref32 = reference_forward(x, weight, bias, softmax=True, matmul_dtype=jnp.float32)
    assert jnp.allclose(out32, ref32, atol=2e-2, rtol=2e-2), "mismatch (f32 path)"

    # 4) ragged row count + multi-step grid with masked edge tile (no row padding)
    b2, s2 = 3, 50  # M = 150 rows -> grid of 2 with tm=128, last tile partially masked
    x2 = jax.random.normal(jax.random.PRNGKey(1), (b2, s2, d_model), dtype=jnp.float32)
    out2 = jax.block_until_ready(generator_forward(x2, weight, bias, softmax=True, tm=128))
    ref2 = reference_forward(x2, weight, bias, softmax=True, matmul_dtype=jnp.bfloat16)
    assert out2.shape == (b2, s2, vocab)
    assert jnp.allclose(out2, ref2, atol=2e-3, rtol=2e-3), "mismatch on ragged/multi-tile M"

    print("KERNEL_OK")
</pallas_src>

<mosaic_0001>
module attributes {stable_mosaic.version = 11 : i64} {
  func.func @_generator_kernel(%arg0: i32, %arg1: memref<16x32xf32, #tpu.memory_space<vmem>>, %arg2: memref<32x128xbf16, #tpu.memory_space<vmem>>, %arg3: memref<1x128xf32, #tpu.memory_space<vmem>>, %arg4: memref<16x128xf32, #tpu.memory_space<vmem>>) attributes {dimension_semantics = [#tpu.dimension_semantics<parallel>], iteration_bounds = array<i64: 1>, scalar_prefetch = 0 : i64, scratch_operands = 0 : i64, tpu.core_type = #tpu.core_type<tc>, window_params = [{transform_indices = @transform_0, window_bounds = array<i64: 16, 32>}, {pipeline_mode = #tpu.pipeline_mode<synchronous>, transform_indices = @transform_1, window_bounds = array<i64: 32, 128>}, {pipeline_mode = #tpu.pipeline_mode<synchronous>, transform_indices = @transform_2, window_bounds = array<i64: 1, 128>}, {transform_indices = @transform_3, window_bounds = array<i64: 16, 128>}]} {
    %c0 = arith.constant 0 : index
    %c0_0 = arith.constant 0 : index
    %0 = vector.load %arg1[%c0, %c0_0] : memref<16x32xf32, #tpu.memory_space<vmem>>, vector<16x32xf32>
    %1 = arith.truncf %0 : vector<16x32xf32> to vector<16x32xbf16>
    %c0_1 = arith.constant 0 : index
    %c0_2 = arith.constant 0 : index
    %2 = vector.load %arg2[%c0_1, %c0_2] : memref<32x128xbf16, #tpu.memory_space<vmem>>, vector<32x128xbf16>
    %cst = arith.constant dense<0.000000e+00> : vector<16x128xf32>
    %3 = tpu.matmul %1, %2, %cst {dimension_numbers = #tpu.dot_dimension_numbers<[1], [0], [0], [1], [0, 0, 1, 1], [], []>} : vector<16x32xbf16>, vector<32x128xbf16>, vector<16x128xf32> -> vector<16x128xf32>
    %c0_3 = arith.constant 0 : index
    %c0_4 = arith.constant 0 : index
    %4 = vector.load %arg3[%c0_3, %c0_4] : memref<1x128xf32, #tpu.memory_space<vmem>>, vector<1x128xf32>
    %5 = vector.broadcast %4 : vector<1x128xf32> to vector<16x128xf32>
    %6 = arith.addf %3, %5 : vector<16x128xf32>
    %cst_5 = arith.constant dense<0xFF800000> : vector<16xf32>
    %7 = vector.multi_reduction <maximumf>, %6, %cst_5 [1] : vector<16x128xf32> to vector<16xf32>
    %8 = vector.shape_cast %7 : vector<16xf32> to vector<16x1xf32>
    %9 = vector.broadcast %8 : vector<16x1xf32> to vector<16x128xf32>
    %10 = arith.subf %6, %9 : vector<16x128xf32>
    %11 = math.exp %10 : vector<16x128xf32>
    %cst_6 = arith.constant dense<0.000000e+00> : vector<16xf32>
    %12 = vector.multi_reduction <add>, %11, %cst_6 [1] : vector<16x128xf32> to vector<16xf32>
    %13 = vector.shape_cast %12 : vector<16xf32> to vector<16x1xf32>
    %14 = math.log %13 : vector<16x1xf32>
    %15 = vector.broadcast %14 : vector<16x1xf32> to vector<16x128xf32>
    %16 = arith.subf %10, %15 : vector<16x128xf32>
    %c0_7 = arith.constant 0 : index
    %c0_8 = arith.constant 0 : index
    %17 = vector.load %arg4[%c0_7, %c0_8] : memref<16x128xf32, #tpu.memory_space<vmem>>, vector<16x128xf32>
    tpu.vector_store %arg4[%c0_7, %c0_8], %16 {strides = array<i32>} : memref<16x128xf32, #tpu.memory_space<vmem>>, vector<16x128xf32>,
    return
  }
  func.func @transform_0(%arg0: i32) -> (i32, i32) {
    %c0_i32 = arith.constant 0 : i32
    %c0_i32_0 = arith.constant 0 : i32
    return %arg0, %c0_i32 : i32, i32
  }
  func.func @transform_1(%arg0: i32) -> (i32, i32) {
    %c0_i32 = arith.constant 0 : i32
    %c0_i32_0 = arith.constant 0 : i32
    %c0_i32_1 = arith.constant 0 : i32
    return %c0_i32, %c0_i32_0 : i32, i32
  }
  func.func @transform_2(%arg0: i32) -> (i32, i32) {
    %c0_i32 = arith.constant 0 : i32
    %c0_i32_0 = arith.constant 0 : i32
    %c0_i32_1 = arith.constant 0 : i32
    return %c0_i32, %c0_i32_0 : i32, i32
  }
  func.func @transform_3(%arg0: i32) -> (i32, i32) {
    %c0_i32 = arith.constant 0 : i32
    %c0_i32_0 = arith.constant 0 : i32
    return %arg0, %c0_i32 : i32, i32
  }
}

</mosaic_0001>

<bundles_post_ra>
// kernel: tpu_custom_call.1
= control target key start
LH: loop header
LB: loop body
LE: loop exit
PB: predicated region body
PF: predicated region fallthrough
CT: control target
= control target key end

     0   :  { %8 = vsyncpa [#allocation3], 0  ;;  %s302_s0 = inlined_call_operand.hbm [shape: f32[16,32], index: 0, kind: input, shape index: {}]   ;;  %s303_s1 = inlined_call_operand.hbm [shape: bf16[32,128], index: 1, kind: input, shape index: {}]   ;;  %s304_s2 = inlined_call_operand.vmem [shape: f32[1,128], index: 2, kind: input, shape index: {}]   ;;  %s305_s3 = inlined_call_operand.hbm [shape: f32[16,128], index: 3, kind: output, shape index: {}]  }
   0x1   :  { %9 = vsyncpa [#allocation6], 0 }
   0x2   :  { %10 = vsyncpa [#allocation4], 0  ;;  %s255_s12 = smov [#allocation2]  }
   0x3   :  { %s16_s13 = sshll.u32 %s255_s12, 4  ;;  %s17_s13 = int_to_ptr.vmem [resolvable:$true] %s16_s13 }
   0x4   :  { %s197_s14 = scalar_lea.vmem %s17_s13, 256  ;;  %p202_p1 = scmp.lt.s32.totalorder %s17_s13, %s17_s13 }
   0x5   :  { %p198_p0 = scmp.ne.s32.totalorder %s17_s13, %s197_s14  ;;  %p203_p2 = scmp.lt.s32.totalorder %s197_s14, %s197_s14 }
   0x7   :  { %p204_p3 = por %p203_p2, %p202_p1 }
   0x9   :  { %p205_p4 = pnand %p204_p3, %p198_p0 }
   0xb   :  { %208 = shalt.err (!%p205_p4)
}
   0xc   :  { %s256_s15 = smov 128   ;;  %s257_s16 = smov 8  }
   0xd   :  { %22 = dma.hbm_to_vmem [thread:$0]  %s302_s0, 256, %s17_s13, [#allocation3], %s256_s15, %s256_s15, %s257_s16  }
   0xe   :  { %s258_s19 = smov [#allocation5]  }
   0xf   :  { %s28_s20 = sshll.u32 %s258_s19, 4  ;;  %s29_s20 = int_to_ptr.vmem [resolvable:$true] %s28_s20 }
  0x10   :  { %s217_s21 = scalar_lea.vmem %s29_s20, 256  ;;  %p222_p6 = scmp.lt.s32.totalorder %s29_s20, %s29_s20 }
  0x11   :  { %p218_p5 = scmp.ne.s32.totalorder %s29_s20, %s217_s21  ;;  %p223_p7 = scmp.lt.s32.totalorder %s217_s21, %s217_s21 }
  0x13   :  { %p224_p8 = por %p223_p7, %p222_p6 }
  0x15   :  { %p225_p9 = pnand %p224_p8, %p218_p5 }
  0x17   :  { %228 = shalt.err (!%p225_p9)
}
  0x18   :  { %s259_s22 = smov 64   ;;  %s260_s23 = smov 4  }
  0x19   :  { %34 = dma.hbm_to_vmem [thread:$0]  %s303_s1, 256, %s29_s20, [#allocation6], %s259_s22, %s259_s22, %s260_s23  }
  0x1a   :  { %249 = dma.done.wait [#allocation3], 256  }
  0x1b   :  { %250 = vsyncadd [#allocation3], 4294967040 }
  0x1c   :  { %251 = dma.done.wait [#allocation6], 256  }
  0x1d   :  { %252 = vsyncadd [#allocation6], 4294967040  ;;  %v261_v0 = vmov 0.0   ;;  %vm262_vm0 = vmmov 0   ;;  %v179_v1 = vld [vmem:[#allocation5 + $0x8] sm:$0xff]   ;;  %v180_v2 = vld [vmem:[#allocation5] sm:$0xff]  }
  0x1e   :  { %162 = vmatprep.subr.bf16.mxu0 %v261_v0  ;;  %166 = vmatprep.mubr.msk.bf16.mxu0 %vm262_vm0, %v261_v0  ;;  %v44_v3 = vld [vmem:[#allocation2] sm:$0xff]  ;;  %v45_v4 = vld [vmem:[#allocation2 + $0x8] sm:$0xff]  ;;  %vm70_vm1 = vcmask 261120  }
  0x1f   :  { %163 = vmatpush3.bf16.msra.mxu0 %v179_v1  ;;  %v46_v5 = vpack.c.bf16 %v45_v4, %v44_v3  ;;  %v155_v6 = vld [vmem:[%s304_s2] ss:$0 sm:$0xff]  ;;  %s263_s2 = smov [#allocation7]  }
  0x20   :  { %164 = vmatprep.subr.bf16.mxu0 %v261_v0  ;;  %s142_s26 = sshll.u32 %s263_s2, 4  ;;  %s143_s26 = int_to_ptr.vmem [resolvable:$true] %s142_s26 }
  0x21   :  { %s229_s27 = scalar_lea.vmem %s143_s26, 256  ;;  %p234_p11 = scmp.lt.s32.totalorder %s143_s26, %s143_s26 }
  0x22   :  { %p230_p10 = scmp.ne.s32.totalorder %s143_s26, %s229_s27  ;;  %p235_p12 = scmp.lt.s32.totalorder %s229_s27, %s229_s27 }
  0x23   :  { %165 = vmatpush3.bf16.msra.mxu0 %v180_v2 }
  0x24   :  { %p236_p13 = por %p235_p12, %p234_p11 }
  0x26   :  { %167 = vmatmul.mubr.msk.bf16.vlgmr.msra.gmra.mxu0 %vm70_vm1, %v46_v5  ;;  %p237_p0 = pnand %p236_p13, %p230_p10 }
  0xe6   :  { %v108_v7 = vpop.f32.mrf.mxu0 }
  0xe7   :  { %v109_v8 = vadd.f32 %v155_v6, %v108_v7 }
  0xe8   :  { %v168_v9 = vpop.f32.mrf.mxu0 }
  0xe9   :  { %115 = vmax.xlane.f32.xlu0 %v109_v8 }
  0xea   :  { %v111_v10 = vpop.f32.mrf.mxu0 }
  0xeb   :  { %v112_v11 = vadd.f32 %v155_v6, %v111_v10 }
  0xec   :  { %v169_v12 = vpop.f32.mrf.mxu0 }
  0xed   :  { %117 = vmax.xlane.f32.xlu0 %v112_v11 }
 0x172   :  { %v116_v13 = vpop.xlane.xlu0 %115 }
 0x173   :  { %v119_v14 = vsub.f32 %v109_v8, %v116_v13 }
 0x175   :  { %v121_v15 = vmul.f32 1.442695, %v119_v14 }
 0x176   :  { %v118_v16 = vpop.xlane.xlu0 %117 }
 0x177   :  { %v120_v17 = vsub.f32 %v112_v11, %v118_v16  ;;  %181 = vpow2.f32 %v121_v15 }
 0x179   :  { %v123_v18 = vmul.f32 1.442695, %v120_v17 }
 0x17b   :  { %183 = vpow2.f32 %v123_v18 }
 0x184   :  { %v182_v19 = vpop.eup %181 }
 0x185   :  { %125 = vadd.xlane.f32.xlu1 %v182_v19 }
 0x188   :  { %v184_v20 = vpop.eup %183 }
 0x189   :  { %127 = vadd.xlane.f32.xlu1 %v184_v20 }
 0x20e   :  { %v126_v21 = vpop.xlane.xlu1 %125 }
 0x20f   :  { %185 = vlog2.f32 %v126_v21 }
 0x212   :  { %v128_v22 = vpop.xlane.xlu1 %127 }
 0x213   :  { %187 = vlog2.f32 %v128_v22 }
 0x21c   :  { %v186_v23 = vpop.eup %185 }
 0x21d   :  { %v130_v24 = vmul.f32 0.6931472, %v186_v23 }
 0x21f   :  { %v133_v25 = vsub.f32 %v119_v14, %v130_v24 }
 0x220   :  { %v188_v26 = vpop.eup %187 }
 0x221   :  { %v132_v27 = vmul.f32 0.6931472, %v188_v26  ;;  %135 = vst [vmem:[#allocation7] sm:$0xff] %v133_v25 }
 0x223   :  { %v134_v28 = vsub.f32 %v120_v17, %v132_v27 }
 0x225   :  { %136 = vst [vmem:[#allocation7 + $0x8] sm:$0xff] %v134_v28 }
 0x226   :  { %240 = shalt.err (!%p237_p0)
}
 0x227   :  { %148 = dma.vmem_to_hbm [thread:$0]  %s143_s26, 256, %s305_s3, [#allocation4], %s256_s15, %s256_s15, %s257_s16  }
 0x228   :  { %253 = dma.done.wait [#allocation4], 256  }
 0x229   :  { %254 = vsyncadd [#allocation4], 4294967040 }
 0x22a   :  { %152 = vsyncpa [#allocation3], 1 }
 0x22b   :  { %153 = vsyncpa [#allocation6], 1 }
 0x22c   :  { %154 = vsyncpa [#allocation4], 1 }

</bundles_post_ra>
